<compile_context>
chip_gen: v6e
topology: v6e:2x2x1
jax: 0.10.0
libtpu: 0.0.40
codegen_flags: <defaults>
</compile_context>

<pallas_src>
import jax
import jax.numpy as jnp
from jax.experimental import pallas as pl
from jax.experimental.pallas import tpu as pltpu


def gcn_kernel(x_ref, adj_ref, w1_ref, b1_ref, w2_ref, b2_ref, o_ref):
    # One grid step == one batch element (batch axis is "parallel").
    # x_ref:   (1, N, Fin)   this batch element
    # adj_ref: (N, N)        shared across the batch (constant index_map -> fetched once)
    # w1_ref:  (Fin, H), b1_ref: (1, H)
    # w2_ref:  (H, Fout), b2_ref: (1, Fout)
    # o_ref:   (1, N, Fout)  final layout -- no post-kernel transpose needed
    adj = adj_ref[...]                                                   # (N, N)
    x = x_ref[0]                                                         # (N, Fin)

    # --- layer 1: support = x @ W1, aggregate with adj, bias, ReLU ---
    s1 = jnp.dot(x, w1_ref[...], preferred_element_type=jnp.float32)     # (N, H)
    z1 = jnp.dot(adj, s1, preferred_element_type=jnp.float32) + b1_ref[...]
    h = jnp.maximum(z1, 0.0)                                             # (N, H)

    # dropout: eval mode -> identity
    # TODO(synk): training-mode dropout (pltpu.prng_random_bits mask + 1/(1-p)) not emitted.

    # --- layer 2 ---
    s2 = jnp.dot(h, w2_ref[...], preferred_element_type=jnp.float32)     # (N, Fout)
    z2 = jnp.dot(adj, s2, preferred_element_type=jnp.float32) + b2_ref[...]

    o_ref[0] = z2.astype(o_ref.dtype)


def gcn_forward(x, adj, w1, b1, w2, b2):
    B, N, Fin = x.shape
    H = w1.shape[1]
    Fout = w2.shape[1]

    flops = 2 * B * (N * Fin * H + N * N * H + N * H * Fout + N * N * Fout)
    bytes_accessed = 4 * (x.size + adj.size + w1.size + b1.size
                          + w2.size + b2.size + B * N * Fout)

    return pl.pallas_call(
        gcn_kernel,
        out_shape=jax.ShapeDtypeStruct((B, N, Fout), jnp.float32),
        grid=(B,),  # batch-parallel grid: shards across TensorCores on v7x
        in_specs=[
            pl.BlockSpec((1, N, Fin), lambda b: (b, 0, 0)),   # x, per-batch slice
            pl.BlockSpec((N, N), lambda b: (0, 0)),           # adj (shared, fetched once)
            pl.BlockSpec((Fin, H), lambda b: (0, 0)),         # W1
            pl.BlockSpec((1, H), lambda b: (0, 0)),           # b1
            pl.BlockSpec((H, Fout), lambda b: (0, 0)),        # W2
            pl.BlockSpec((1, Fout), lambda b: (0, 0)),        # b2
        ],
        out_specs=pl.BlockSpec((1, N, Fout), lambda b: (b, 0, 0)),  # final layout
        compiler_params=pltpu.CompilerParams(
            dimension_semantics=("parallel",),
        ),
        cost_estimate=pl.CostEstimate(
            flops=flops, transcendentals=0, bytes_accessed=bytes_accessed),
    )(x, adj, w1, b1, w2, b2)


def gcn_reference(x, adj, w1, b1, w2, b2):
    # Pure-JAX reference matching the PyTorch forward (eval mode).
    adj_b = jnp.broadcast_to(adj, (x.shape[0],) + adj.shape)
    h = jax.nn.relu(jnp.matmul(adj_b, jnp.matmul(x, w1)) + b1)
    return jnp.matmul(adj_b, jnp.matmul(h, w2)) + b2


if __name__ == "__main__":
    # Small shapes consistent with the module.
    B, N = 2, 16               # batch, nodeNum
    Fin, H, Fout = 8, 32, 16   # inputDim, hidDim, outputDim
    dropout_p = 0.5            # unused in eval-mode forward

    key = jax.random.PRNGKey(0)
    kx, kadj, kw1, kb1, kw2, kb2 = jax.random.split(key, 6)

    x = jax.random.normal(kx, (B, N, Fin), dtype=jnp.float32)

    # Symmetric normalized-ish adjacency (deterministic, built in-script).
    a = jax.random.uniform(kadj, (N, N), dtype=jnp.float32)
    a = (a + a.T) * 0.5 + jnp.eye(N, dtype=jnp.float32)
    deg = jnp.sum(a, axis=-1, keepdims=True)
    adj = a / deg

    # GraphConvolution init: uniform(-stdv, stdv), stdv = 1/sqrt(out_features)
    stdv1 = 1.0 / jnp.sqrt(jnp.float32(H))
    w1 = jax.random.uniform(kw1, (Fin, H), jnp.float32, -stdv1, stdv1)
    b1 = jax.random.uniform(kb1, (1, H), jnp.float32, -stdv1, stdv1)
    stdv2 = 1.0 / jnp.sqrt(jnp.float32(Fout))
    w2 = jax.random.uniform(kw2, (H, Fout), jnp.float32, -stdv2, stdv2)
    b2 = jax.random.uniform(kb2, (1, Fout), jnp.float32, -stdv2, stdv2)

    out = gcn_forward(x, adj, w1, b1, w2, b2)
    jax.block_until_ready(out)

    ref = gcn_reference(x, adj, w1, b1, w2, b2)
    assert out.shape == (B, N, Fout)
    assert jnp.allclose(out, ref, atol=1e-5, rtol=1e-5)

    print("KERNEL_OK")
</pallas_src>

<mosaic_0001>
module attributes {stable_mosaic.version = 11 : i64} {
  func.func @gcn_kernel(%arg0: i32, %arg1: memref<1x16x8xf32, #tpu.memory_space<vmem>>, %arg2: memref<16x16xf32, #tpu.memory_space<vmem>>, %arg3: memref<8x32xf32, #tpu.memory_space<vmem>>, %arg4: memref<1x32xf32, #tpu.memory_space<vmem>>, %arg5: memref<32x16xf32, #tpu.memory_space<vmem>>, %arg6: memref<1x16xf32, #tpu.memory_space<vmem>>, %arg7: memref<1x16x16xf32, #tpu.memory_space<vmem>>) attributes {dimension_semantics = [#tpu.dimension_semantics<parallel>], iteration_bounds = array<i64: 2>, scalar_prefetch = 0 : i64, scratch_operands = 0 : i64, tpu.core_type = #tpu.core_type<tc>, window_params = [{transform_indices = @transform_0, window_bounds = array<i64: 1, 16, 8>}, {pipeline_mode = #tpu.pipeline_mode<synchronous>, transform_indices = @transform_1, window_bounds = array<i64: 16, 16>}, {pipeline_mode = #tpu.pipeline_mode<synchronous>, transform_indices = @transform_2, window_bounds = array<i64: 8, 32>}, {pipeline_mode = #tpu.pipeline_mode<synchronous>, transform_indices = @transform_3, window_bounds = array<i64: 1, 32>}, {pipeline_mode = #tpu.pipeline_mode<synchronous>, transform_indices = @transform_4, window_bounds = array<i64: 32, 16>}, {pipeline_mode = #tpu.pipeline_mode<synchronous>, transform_indices = @transform_5, window_bounds = array<i64: 1, 16>}, {transform_indices = @transform_6, window_bounds = array<i64: 1, 16, 16>}]} {
    %c0 = arith.constant 0 : index
    %c0_0 = arith.constant 0 : index
    %0 = vector.load %arg2[%c0, %c0_0] : memref<16x16xf32, #tpu.memory_space<vmem>>, vector<16x16xf32>
    %c0_1 = arith.constant 0 : index
    %c0_2 = arith.constant 0 : index
    %c0_3 = arith.constant 0 : index
    %1 = vector.load %arg1[%c0_1, %c0_2, %c0_3] : memref<1x16x8xf32, #tpu.memory_space<vmem>>, vector<1x16x8xf32>
    %2 = vector.shape_cast %1 : vector<1x16x8xf32> to vector<16x8xf32>
    %c0_4 = arith.constant 0 : index
    %c0_5 = arith.constant 0 : index
    %3 = vector.load %arg3[%c0_4, %c0_5] : memref<8x32xf32, #tpu.memory_space<vmem>>, vector<8x32xf32>
    %cst = arith.constant dense<0.000000e+00> : vector<16x32xf32>
    %4 = tpu.matmul %2, %3, %cst {dimension_numbers = #tpu.dot_dimension_numbers<[1], [0], [0], [1], [0, 0, 1, 1], [], []>} : vector<16x8xf32>, vector<8x32xf32>, vector<16x32xf32> -> vector<16x32xf32>
    %cst_6 = arith.constant dense<0.000000e+00> : vector<16x32xf32>
    %5 = tpu.matmul %0, %4, %cst_6 {dimension_numbers = #tpu.dot_dimension_numbers<[1], [0], [0], [1], [0, 0, 1, 1], [], []>} : vector<16x16xf32>, vector<16x32xf32>, vector<16x32xf32> -> vector<16x32xf32>
    %c0_7 = arith.constant 0 : index
    %c0_8 = arith.constant 0 : index
    %6 = vector.load %arg4[%c0_7, %c0_8] : memref<1x32xf32, #tpu.memory_space<vmem>>, vector<1x32xf32>
    %7 = vector.broadcast %6 : vector<1x32xf32> to vector<16x32xf32>
    %8 = arith.addf %5, %7 : vector<16x32xf32>
    %cst_9 = arith.constant 0.000000e+00 : f32
    %9 = vector.broadcast %cst_9 : f32 to vector<16x32xf32>
    %10 = arith.maximumf %8, %9 : vector<16x32xf32>
    %c0_10 = arith.constant 0 : index
    %c0_11 = arith.constant 0 : index
    %11 = vector.load %arg5[%c0_10, %c0_11] : memref<32x16xf32, #tpu.memory_space<vmem>>, vector<32x16xf32>
    %cst_12 = arith.constant dense<0.000000e+00> : vector<16x16xf32>
    %12 = tpu.matmul %10, %11, %cst_12 {dimension_numbers = #tpu.dot_dimension_numbers<[1], [0], [0], [1], [0, 0, 1, 1], [], []>} : vector<16x32xf32>, vector<32x16xf32>, vector<16x16xf32> -> vector<16x16xf32>
    %cst_13 = arith.constant dense<0.000000e+00> : vector<16x16xf32>
    %13 = tpu.matmul %0, %12, %cst_13 {dimension_numbers = #tpu.dot_dimension_numbers<[1], [0], [0], [1], [0, 0, 1, 1], [], []>} : vector<16x16xf32>, vector<16x16xf32>, vector<16x16xf32> -> vector<16x16xf32>
    %c0_14 = arith.constant 0 : index
    %c0_15 = arith.constant 0 : index
    %14 = vector.load %arg6[%c0_14, %c0_15] : memref<1x16xf32, #tpu.memory_space<vmem>>, vector<1x16xf32>
    %15 = vector.broadcast %14 : vector<1x16xf32> to vector<16x16xf32>
    %16 = arith.addf %13, %15 : vector<16x16xf32>
    %c0_16 = arith.constant 0 : index
    %c0_17 = arith.constant 0 : index
    %c0_18 = arith.constant 0 : index
    %17 = vector.load %arg7[%c0_16, %c0_17, %c0_18] : memref<1x16x16xf32, #tpu.memory_space<vmem>>, vector<1x16x16xf32>
    %18 = vector.shape_cast %17 : vector<1x16x16xf32> to vector<16x16xf32>
    %19 = vector.shape_cast %16 : vector<16x16xf32> to vector<1x16x16xf32>
    tpu.vector_store %arg7[%c0_16, %c0_17, %c0_18], %19 {strides = array<i32>} : memref<1x16x16xf32, #tpu.memory_space<vmem>>, vector<1x16x16xf32>,
    return
  }
  func.func @transform_0(%arg0: i32) -> (i32, i32, i32) {
    %c0_i32 = arith.constant 0 : i32
    %c0_i32_0 = arith.constant 0 : i32
    %c0_i32_1 = arith.constant 0 : i32
    return %arg0, %c0_i32, %c0_i32_0 : i32, i32, i32
  }
  func.func @transform_1(%arg0: i32) -> (i32, i32) {
    %c0_i32 = arith.constant 0 : i32
    %c0_i32_0 = arith.constant 0 : i32
    %c0_i32_1 = arith.constant 0 : i32
    return %c0_i32, %c0_i32_0 : i32, i32
  }
  func.func @transform_2(%arg0: i32) -> (i32, i32) {
    %c0_i32 = arith.constant 0 : i32
    %c0_i32_0 = arith.constant 0 : i32
    %c0_i32_1 = arith.constant 0 : i32
    return %c0_i32, %c0_i32_0 : i32, i32
  }
  func.func @transform_3(%arg0: i32) -> (i32, i32) {
    %c0_i32 = arith.constant 0 : i32
    %c0_i32_0 = arith.constant 0 : i32
    %c0_i32_1 = arith.constant 0 : i32
    return %c0_i32, %c0_i32_0 : i32, i32
  }
  func.func @transform_4(%arg0: i32) -> (i32, i32) {
    %c0_i32 = arith.constant 0 : i32
    %c0_i32_0 = arith.constant 0 : i32
    %c0_i32_1 = arith.constant 0 : i32
    return %c0_i32, %c0_i32_0 : i32, i32
  }
  func.func @transform_5(%arg0: i32) -> (i32, i32) {
    %c0_i32 = arith.constant 0 : i32
    %c0_i32_0 = arith.constant 0 : i32
    %c0_i32_1 = arith.constant 0 : i32
    return %c0_i32, %c0_i32_0 : i32, i32
  }
  func.func @transform_6(%arg0: i32) -> (i32, i32, i32) {
    %c0_i32 = arith.constant 0 : i32
    %c0_i32_0 = arith.constant 0 : i32
    %c0_i32_1 = arith.constant 0 : i32
    return %arg0, %c0_i32, %c0_i32_0 : i32, i32, i32
  }
}

</mosaic_0001>

<bundles_post_ra>
// kernel: tpu_custom_call.1
= control target key start
LH: loop header
LB: loop body
LE: loop exit
PB: predicated region body
PF: predicated region fallthrough
CT: control target
= control target key end

     0   :  { %11 = vsyncpa [#allocation3], 0  ;;  %s1021_s0 = inlined_call_operand.vmem [shape: f32[2,16,8], index: 0, kind: input, shape index: {}]   ;;  %s1022_s1 = inlined_call_operand.vmem [shape: f32[16,16], index: 1, kind: input, shape index: {}]   ;;  %s1023_s2 = inlined_call_operand.vmem [shape: f32[8,32], index: 2, kind: input, shape index: {}]   ;;  %s1024_s3 = inlined_call_operand.vmem [shape: f32[1,32], index: 3, kind: input, shape index: {}]   ;;  %s1025_s4 = inlined_call_operand.vmem [shape: f32[32,16], index: 4, kind: input, shape index: {}]   ;;  %s1026_s5 = inlined_call_operand.vmem [shape: f32[1,16], index: 5, kind: input, shape index: {}]   ;;  %s1027_s6 = inlined_call_operand.hbm [shape: f32[2,16,16], index: 6, kind: output, shape index: {}]  }
   0x1   :  { %13 = vsyncpa [#allocation3 + $0x1], 0  ;;  %s886_s21 = smov 0   ;;  %s888_s22 = smov 0  }
   0x2   :  { %s890_s23 = smov 0   ;;  %s892_s24 = smov 0  }
   0x3 LB: > { %s907_s25 = sadd.s32 4294967295, %s846_s24   ;;  %s674_s26 = sadd.s32 4294967294, %s846_s24   ;;  %s846_s24 = sphi %s892_s24, %s1033_s24   ;;  %s842_s23 = sphi %s890_s23, %s1032_s23   ;;  %s838_s22 = sphi %s888_s22, %s1031_s22   ;;  %s834_s21 = sphi %s886_s21, %s1030_s21  }
   0x4   : > { %s911_s27 = sadd.s32 1, %s846_s24   ;;  %s157_s28 = sadd.s32 1, %s842_s23 }
   0x5   : > { %s154_s29 = ssub.s32 %s846_s24, %s911_s27  ;;  %p167_p0 = scmp.ne.s32.totalorder %s842_s23, %s838_s22 }
   0x6   : > { %p155_p1 = scmp.eq.s32.totalorder %s154_s29, 0  ;;  %p168_p2 = scmp.eq.s32.totalorder %s907_s25, 1 }
   0x7   : > { %p173_p3 = scmp.ne.s32.totalorder %s838_s22, %s834_s21  ;;  %p174_p4 = scmp.eq.s32.totalorder %s674_s26, 1 }
   0x8   : > { %s922_s30 = scalar_select %p155_p1, %s842_s23, %s157_s28  }
   0x9   : > { %p924_p5 = por %p168_p2, %p167_p0  ;;  %p928_p6 = por %p174_p4, %p173_p3 }
   0xa   : > { %p677_p7 = scmp.ge.s32.totalorder %s846_s24, 1  ;;  %p215_p8 = scmp.lt.s32.totalorder %s846_s24, 3 }
   0xc   : > { %p216_p9 = pnand %p677_p7, %p215_p8 }
   0xd   : > { %p245_p10 = scmp.lt.s32.totalorder (!%p216_p9), %s907_s25, 1  ;;  %s697_s26 = sshll.u32 (!%p216_p9), %s907_s25, 8 }
   0xe   : > { %219 = sbr.rel (%p216_p9) target bundleno = 830 (0x33e), region = 44  ;;  %s977_s9 = scalar_lea.hbm (!%p216_p9), %s1027_s6, %s697_s26 }
  0x13   : > { %v254_v0 = vld [vmem:[%s1023_s2] sm:$0xff]  ;;  %s246_s11 = scalar_select %p245_p10, %s907_s25, 1  ;;  %vm255_vm0 = vcmask 64512   ;;  %vm344_vm1 = vcmask 130048   ;;  %v251_v6 = vld [vmem:[%s1022_s1 + $0x8] sm:$0xff]  ;;  %v431_v7 = vld [vmem:[%s1025_s4 + $0x18] sm:$0xff] }
  0x14   : > { %715 = vmatprep.subr.mxu0 %v254_v0  ;;  %v250_v3 = vld [vmem:[%s1022_s1] sm:$0xff]  ;;  %v430_v8 = vld [vmem:[%s1025_s4 + $0x10] sm:$0xff]  ;;  %v429_v9 = vld [vmem:[%s1025_s4 + $0x8] sm:$0xff]  ;;  %vm432_vm2 = vcmask 261120  }
  0x15   : > { %716 = vmatpush3.msra.mxu0 %v254_v0  ;;  %s696_s12 = sshll.u32 %s246_s11, 4  ;;  %724 = vmatprep.mubr.msk.f32.mxu1 %vm344_vm1, %v250_v3  ;;  %v428_v10 = vld [vmem:[%s1025_s4] sm:$0xff]  ;;  %s848_s11 = smov [#allocation2]  }
  0x16   : > { %s249_s15 = scalar_lea.vmem %s1021_s0, %s696_s12  ;;  %727 = vmatprep.subr.mxu0 %v431_v7  ;;  %v683_v11 = vld [vmem:[%s1024_s3] ss:$0 sm:$0xff]  ;;  %s790_s12 = sshll.u32 %s848_s11, 4  ;;  %s791_s12 = int_to_ptr.vmem [resolvable:$false] %s790_s12 }
  0x17   : > { %v252_v1 = vld [vmem:[%s249_s15] sm:$0xff]  ;;  %v253_v2 = vld [vmem:[%s249_s15 + $0x8] sm:$0xff]  ;;  %s242_s15 = sand.u32 1, %s838_s22   ;;  %s792_s13 = scalar_lea.vmem %s791_s12, 512 }
  0x18   : > { %717 = vmatprep.mubr.msk.f32.mxu0 %vm255_vm0, %v252_v1  ;;  %s678_s16 = sshll.u32 %s242_s15, 4  ;;  %v688_v20 = vld [vmem:[%s1026_s5] ss:$0 sm:$0xff]  ;;  %s981_s10 = scalar_lea.sflag [#allocation3], %s242_s15 }
  0x19   : > { %718 = vmatmul.mubr.msk.f32.vlgmr.msra.gmra.mxu0 %vm255_vm0, %v253_v2  ;;  %s244_s19 = scalar_lea.vmem [#allocation2], %s678_s16 }
  0x1a   : > { %728 = vmatpush3.msra.mxu0 %v431_v7  ;;  %s612_s20 = sshll.u32 %s244_s19, 4  ;;  %s972_s20 = int_to_ptr.vmem [resolvable:$true] %s612_s20 }
  0x1b   : > { %729 = vmatprep.subr.mxu0 %v430_v8  ;;  %s786_s25 = scalar_lea.vmem %s972_s20, 256  ;;  %p793_p0 = scmp.lt.s32.totalorder %s972_s20, %s791_s12 }
  0x1c   : > { %730 = vmatpush3.msra.mxu0 %v430_v8  ;;  %p787_p11 = scmp.ne.s32.totalorder %s972_s20, %s786_s25  ;;  %p794_p1 = scmp.lt.s32.totalorder %s792_s13, %s786_s25 }
  0x1d   : > { %731 = vmatprep.subr.mxu0 %v429_v9 }
  0x1e   : > { %732 = vmatpush3.msra.mxu0 %v429_v9  ;;  %p788_p12 = pnand %p787_p11, %p924_p5  ;;  %p795_p2 = por %p794_p1, %p793_p0 }
  0x1f   : > { %733 = vmatprep.subr.mxu0 %v428_v10 }
  0x20   : > { %734 = vmatpush3.msra.mxu0 %v428_v10  ;;  %p789_p13 = pneg %p788_p12 }
  0x22   : > { %p796_p3 = pnand %p795_p2, %p789_p13 }
  0xd9   : > { %v719_v4 = vpop.f32.mrf.mxu0 }
  0xda   : > { %720 = vmatprep.subr.mxu1 %v719_v4 }
  0xdb   : > { %v328_v5 = vpop.f32.mrf.mxu0  ;;  %721 = vmatpush3.msra.mxu1 %v719_v4 }
  0xdc   : > { %722 = vmatprep.subr.mxu1 %v328_v5 }
  0xdd   : > { %723 = vmatpush3.msra.mxu1 %v328_v5 }
  0xde   : > { %725 = vmatmul.mubr.msk.f32.vlgmr.msra.gmra.mxu1 %vm344_vm1, %v251_v6 }
  0xdf   : > { %742 = vmatprep.mubr.msk.f32.mxu1 %vm344_vm1, %v250_v3 }
 0x19e   : > { %v726_v12 = vpop.f32.mrf.mxu1 }
 0x19f   : > { %v423_v13 = vadd.f32 %v726_v12, %v683_v11 }
 0x1a0   : > { %v417_v14 = vpop.f32.mrf.mxu1 }
 0x1a1   : > { %v418_v15 = vadd.f32 %v683_v11, %v417_v14  ;;  %v427_v17 = vmax.f32 %v423_v13, 0.0 }
 0x1a3   : > { %v426_v16 = vmax.f32 %v418_v15, 0.0 }
 0x1a5   : > { %735 = vmatprep.mubr.msk.f32.mxu0 %vm432_vm2, %v426_v16 }
 0x1a6   : > { %736 = vmatmul.mubr.msk.f32.vlgmr.msra.gmra.mxu0 %vm432_vm2, %v427_v17 }
 0x266   : > { %v737_v18 = vpop.f32.mrf.mxu0 }
 0x267   : > { %738 = vmatprep.subr.mxu1 %v737_v18 }
 0x268   : > { %v505_v19 = vpop.f32.mrf.mxu0  ;;  %739 = vmatpush3.msra.mxu1 %v737_v18 }
 0x269   : > { %740 = vmatprep.subr.mxu1 %v505_v19 }
 0x26a   : > { %741 = vmatpush3.msra.mxu1 %v505_v19 }
 0x26b   : > { %743 = vmatmul.mubr.msk.f32.vlgmr.msra.gmra.mxu1 %vm344_vm1, %v251_v6 }
 0x32b   : > { %v744_v21 = vpop.f32.mrf.mxu1 }
 0x32c   : > { %v593_v22 = vadd.f32 %v744_v21, %v688_v20 }
 0x32d   : > { %v587_v23 = vpop.f32.mrf.mxu1 }
 0x32e   : > { %597 = vst.msk [vmem:[%s244_s19 + $0x8] sm:$0xff] %vm344_vm1, %v593_v22  ;;  %v588_v24 = vadd.f32 %v688_v20, %v587_v23 }
 0x330   : > { %596 = vst.msk [vmem:[%s244_s19] sm:$0xff] %vm344_vm1, %v588_v24 }
 0x331   : > { %799 = shalt.err (!%p796_p3)
}
 0x332   : > { %s800_s14 = scalar_lea.hbm %s977_s9, 256  ;;  %s804_s17 = scalar_lea.hbm %s1027_s6, 512 }
 0x333   : > { %p801_p4 = scmp.ne.s32.totalorder %s977_s9, %s800_s14  ;;  %p805_p9 = scmp.lt.s32.totalorder %s977_s9, %s1027_s6 }
 0x334   : > { %p806_p10 = scmp.lt.s32.totalorder %s804_s17, %s800_s14 }
 0x335   : > { %p802_p7 = pnand %p801_p4, %p924_p5 }
 0x336   : > { %p807_p11 = por %p806_p10, %p805_p9 }
 0x337   : > { %p803_p8 = pneg %p802_p7 }
 0x339   : > { %p808_p12 = pnand %p807_p11, %p803_p8 }
 0x33b   : > { %811 = shalt.err (!%p808_p12)
}
 0x33c   : > { %s849_s26 = smov 128   ;;  %s850_s28 = smov 8  }
 0x33d   : > { %745 = dma.vmem_to_hbm [thread:$0]  (%p924_p5), %s972_s20, 256, %s977_s9, %s981_s10, %s849_s26, %s849_s26, %s850_s28  }
 0x33e PF: > { %p751_p13 = scmp.ge.s32.totalorder %s846_s24, 2  ;;  %s627_s29 = sand.u32 1, %s834_s21  }
 0x33f   : > { %s628_s25 = scalar_lea.sflag [#allocation3], %s627_s29 }
 0x340   : > { %p748_p0 = pnand %p751_p13, %p928_p6 }
 0x342   : > { %p749_p1 = pneg %p748_p0 }
 0x344   : > { %829 = dma.done.wait (%p749_p1), %s628_s25, 256  }
 0x345   : > { %831 = vsyncadd (%p749_p1), %s628_s25, 4294967040  ;;  %p16_p2 = scmp.ge.s32.totalorder %s911_s27, 4   ;;  %s1030_s21 = smov %s838_s22 }
 0x346   : > { %s1031_s22 = smov %s842_s23  ;;  %s1032_s23 = smov %s922_s30 }
 0x347   : > { %s1033_s24 = smov %s911_s27  ;;  %18 = sbr.rel (!%p16_p2) target bundleno = 3 (0x3), region = 79 }
 0x34c   :  { %633 = vsyncpa [#allocation3], 1 }
 0x34d   :  { %635 = vsyncpa [#allocation3 + $0x1], 1 }

</bundles_post_ra>
